<compile_context>
chip_gen: v5e
topology: v5e:2x2
jax: 0.10.0
libtpu: 0.0.40
codegen_flags: <defaults>
</compile_context>

<pallas_src>
import jax
import jax.numpy as jnp
from jax.experimental import pallas as pl
from jax.experimental.pallas import tpu as pltpu

# ---- small, deterministic config (stands in for `cfg`) ----
B = 2
IN_CHANS = 4
H = W = 16
HW = H * W
C_FEAT = 128          # backbone_out == head_in_units
ATT_HIDDEN = 512      # fixed by the module: nn.Linear(backbone_out, 512)
MAXLEN = 8            # cfg.maxlen
N_CLASSES = 4         # len(cfg.label_cols)
HEAD_PAD = 128        # lane-padded head width (sliced back to N_CLASSES on host)


# -------- fused kernel: 1x1 backbone + masked cell pooling + attention + head --------
# TODO(synk): the timm backbone is an arbitrary pretrained CNN; it is replaced here by a
# single pointwise (1x1) projection 4 -> C_FEAT so the rest of the forward is exact.
# TODO(synk): torch.randperm cell subsampling is non-deterministic; cells 1..maxlen are
# pooled in fixed id order. Since mask ids are in {0..maxlen} this covers all present
# cells, missing cells become zero rows (matching the PyTorch zero-padding branch), and
# the attention + head + sum over cells is permutation-invariant, so logits are identical.
def fused_net_kernel(x_ref, m_ref, bbw_ref, bbb_ref, w1_ref, b1_ref, w2_ref,
                     hw_ref, hb_ref, out_ref, feat_ref):
    # 1) backbone stand-in: per-pixel projection (HW, Cin) @ (Cin, C) + b -> VMEM scratch
    feat_ref[...] = (
        jnp.dot(x_ref[0], bbw_ref[...], preferred_element_type=jnp.float32)
        + bbb_ref[...]
    )

    # 2) per-cell masked means via one one-hot build + one MXU matmul
    m = m_ref[0]                                                      # (1, HW) int32
    cell_ids = jax.lax.broadcasted_iota(jnp.int32, (MAXLEN, HW), 0) + 1
    onehot = (m == cell_ids).astype(jnp.float32)                      # (MAXLEN, HW)

    counts = jnp.sum(onehot, axis=1, keepdims=True)                   # (MAXLEN, 1)
    sums = jnp.dot(onehot, feat_ref[...],
                   preferred_element_type=jnp.float32)                # (MAXLEN, C)
    cm = jnp.where(counts > 0.0, sums / jnp.maximum(counts, 1.0), 0.0)

    # 3) attention MLP: Linear(C,512) -> ReLU -> Linear(512,1), softmax over cells.
    h1 = jnp.maximum(
        jnp.dot(cm, w1_ref[...], preferred_element_type=jnp.float32) + b1_ref[...],
        0.0)                                                          # (MAXLEN, 512)
    # w2 is passed as a (1, 512) row; VPU mul + lane reduce instead of a (512,1) matmul.
    # The scalar bias b2 is omitted: adding a constant to every cell logit cancels in
    # the softmax over the cell axis, so the forward output is unchanged.
    att_logits = jnp.sum(h1 * w2_ref[...], axis=1, keepdims=True)     # (MAXLEN, 1)
    att_max = jnp.max(att_logits, axis=0, keepdims=True)
    att_exp = jnp.exp(att_logits - att_max)
    att = att_exp / jnp.sum(att_exp, axis=0, keepdims=True)           # (MAXLEN, 1)

    # 4) classification head (lane-padded to 128) + attention-weighted sum over cells
    cell_logits = (jnp.dot(cm, hw_ref[...], preferred_element_type=jnp.float32)
                   + hb_ref[...])                                     # (MAXLEN, 128)
    out_ref[0] = jnp.sum(cell_logits * att, axis=0, keepdims=True)    # (1, 128)


def fused_net(x_rows, mask_rows, bb_w, bb_b, att_w1, att_b1, att_w2_row,
              head_w_pad, head_b_pad):
    Bn = x_rows.shape[0]
    out = pl.pallas_call(
        fused_net_kernel,
        out_shape=jax.ShapeDtypeStruct((Bn, 1, HEAD_PAD), jnp.float32),
        grid_spec=pltpu.PrefetchScalarGridSpec(
            num_scalar_prefetch=0,
            grid=(Bn,),
            in_specs=[
                pl.BlockSpec((1, HW, IN_CHANS), lambda b: (b, 0, 0)),   # x rows
                pl.BlockSpec((1, 1, HW), lambda b: (b, 0, 0)),          # mask (lane-dense)
                pl.BlockSpec((IN_CHANS, C_FEAT), lambda b: (0, 0)),     # bb_w
                pl.BlockSpec((1, C_FEAT), lambda b: (0, 0)),            # bb_b
                pl.BlockSpec((C_FEAT, ATT_HIDDEN), lambda b: (0, 0)),   # att_w1
                pl.BlockSpec((1, ATT_HIDDEN), lambda b: (0, 0)),        # att_b1
                pl.BlockSpec((1, ATT_HIDDEN), lambda b: (0, 0)),        # att_w2 (row)
                pl.BlockSpec((C_FEAT, HEAD_PAD), lambda b: (0, 0)),     # head_w (padded)
                pl.BlockSpec((1, HEAD_PAD), lambda b: (0, 0)),          # head_b (padded)
            ],
            out_specs=pl.BlockSpec((1, 1, HEAD_PAD), lambda b: (b, 0, 0)),
            scratch_shapes=[pltpu.VMEM((HW, C_FEAT), jnp.float32)],     # feat stays on-chip
        ),
        compiler_params=pltpu.CompilerParams(dimension_semantics=("parallel",)),
    )(x_rows, mask_rows, bb_w, bb_b, att_w1, att_b1, att_w2_row,
      head_w_pad, head_b_pad)
    return out.reshape(Bn, HEAD_PAD)[:, :N_CLASSES]


# -------- glue --------
def nearest_resize_mask(m, out_h, out_w):
    # matches F.interpolate(mode='nearest'): src_idx = floor(dst_idx * in_size / out_size)
    Bn, Hm, Wm = m.shape
    ys = (jnp.arange(out_h) * Hm) // out_h
    xs = (jnp.arange(out_w) * Wm) // out_w
    return m[:, ys[:, None], xs[None, :]]


def bce_with_logits_mean(logits, target):
    # nn.BCEWithLogitsLoss (mean reduction), numerically stable; trivial elementwise+mean
    return jnp.mean(jnp.maximum(logits, 0.0) - logits * target
                    + jnp.log1p(jnp.exp(-jnp.abs(logits))))


def net_forward(batch, params):
    x = batch["input"]            # [B, 4, H, W] float32 (NCHW, as in PyTorch)
    m = batch["mask"]             # [B, H, W]   int32 cell ids (0 = background)
    Bn = x.shape[0]

    # 1x1 backbone stand-in keeps the spatial dims, so the feature map is H x W
    Hf, Wf = H, W
    x_rows = jnp.transpose(x, (0, 2, 3, 1)).reshape(Bn, Hf * Wf, IN_CHANS)
    m2 = nearest_resize_mask(m.astype(jnp.float32), Hf, Wf).astype(jnp.int32)
    mask_rows = m2.reshape(Bn, 1, Hf * Wf)

    # lane-pad the 4-class head to 128 columns so the kernel's output store is dense
    head_w_pad = jnp.zeros((C_FEAT, HEAD_PAD), jnp.float32)
    head_w_pad = head_w_pad.at[:, :N_CLASSES].set(params["head_w"])
    head_b_pad = jnp.zeros((1, HEAD_PAD), jnp.float32)
    head_b_pad = head_b_pad.at[:, :N_CLASSES].set(params["head_b"].reshape(1, N_CLASSES))

    logits = fused_net(
        x_rows, mask_rows,
        params["bb_w"], params["bb_b"].reshape(1, C_FEAT),
        params["att_w1"], params["att_b1"].reshape(1, ATT_HIDDEN),
        params["att_w2"].reshape(1, ATT_HIDDEN),   # (512,1) -> (1,512) row
        head_w_pad, head_b_pad)

    loss = bce_with_logits_mean(logits, batch["target"])
    return {"logits": logits, "loss": loss}


if __name__ == "__main__":
    key = jax.random.PRNGKey(0)
    ks = jax.random.split(key, 10)
    params = {
        "bb_w": 0.10 * jax.random.normal(ks[0], (IN_CHANS, C_FEAT), jnp.float32),
        "bb_b": 0.10 * jax.random.normal(ks[1], (C_FEAT,), jnp.float32),
        "att_w1": 0.05 * jax.random.normal(ks[2], (C_FEAT, ATT_HIDDEN), jnp.float32),
        "att_b1": jnp.zeros((ATT_HIDDEN,), jnp.float32),
        "att_w2": 0.05 * jax.random.normal(ks[3], (ATT_HIDDEN, 1), jnp.float32),
        "att_b2": jnp.zeros((1,), jnp.float32),   # cancels in softmax; unused in kernel
        "head_w": 0.05 * jax.random.normal(ks[4], (C_FEAT, N_CLASSES), jnp.float32),
        "head_b": jnp.zeros((N_CLASSES,), jnp.float32),
    }
    x = jax.random.normal(ks[5], (B, IN_CHANS, H, W), jnp.float32)
    mask = jax.random.randint(ks[6], (B, H, W), 0, MAXLEN + 1, dtype=jnp.int32)
    target = jax.random.bernoulli(ks[7], 0.5, (B, N_CLASSES)).astype(jnp.float32)
    batch = {"input": x, "mask": mask, "target": target}

    out = net_forward(batch, params)
    jax.block_until_ready(out["logits"])
    jax.block_until_ready(out["loss"])
    print("KERNEL_OK")
</pallas_src>

<mosaic_0001>
module attributes {stable_mosaic.version = 11 : i64} {
  func.func @fused_net_kernel(%arg0: i32, %arg1: memref<1x256x4xf32, #tpu.memory_space<vmem>>, %arg2: memref<1x1x256xi32, #tpu.memory_space<vmem>>, %arg3: memref<4x128xf32, #tpu.memory_space<vmem>>, %arg4: memref<1x128xf32, #tpu.memory_space<vmem>>, %arg5: memref<128x512xf32, #tpu.memory_space<vmem>>, %arg6: memref<1x512xf32, #tpu.memory_space<vmem>>, %arg7: memref<1x512xf32, #tpu.memory_space<vmem>>, %arg8: memref<128x128xf32, #tpu.memory_space<vmem>>, %arg9: memref<1x128xf32, #tpu.memory_space<vmem>>, %arg10: memref<1x1x128xf32, #tpu.memory_space<vmem>>, %arg11: memref<256x128xf32, #tpu.memory_space<vmem>>) attributes {dimension_semantics = [#tpu.dimension_semantics<parallel>], iteration_bounds = array<i64: 2>, scalar_prefetch = 0 : i64, scratch_operands = 1 : i64, tpu.core_type = #tpu.core_type<tc>, window_params = [{transform_indices = @transform_0, window_bounds = array<i64: 1, 256, 4>}, {transform_indices = @transform_1, window_bounds = array<i64: 1, 1, 256>}, {pipeline_mode = #tpu.pipeline_mode<synchronous>, transform_indices = @transform_2, window_bounds = array<i64: 4, 128>}, {pipeline_mode = #tpu.pipeline_mode<synchronous>, transform_indices = @transform_3, window_bounds = array<i64: 1, 128>}, {pipeline_mode = #tpu.pipeline_mode<synchronous>, transform_indices = @transform_4, window_bounds = array<i64: 128, 512>}, {pipeline_mode = #tpu.pipeline_mode<synchronous>, transform_indices = @transform_5, window_bounds = array<i64: 1, 512>}, {pipeline_mode = #tpu.pipeline_mode<synchronous>, transform_indices = @transform_6, window_bounds = array<i64: 1, 512>}, {pipeline_mode = #tpu.pipeline_mode<synchronous>, transform_indices = @transform_7, window_bounds = array<i64: 128, 128>}, {pipeline_mode = #tpu.pipeline_mode<synchronous>, transform_indices = @transform_8, window_bounds = array<i64: 1, 128>}, {transform_indices = @transform_9, window_bounds = array<i64: 1, 1, 128>}]} {
    %c0 = arith.constant 0 : index
    %c0_0 = arith.constant 0 : index
    %c0_1 = arith.constant 0 : index
    %0 = vector.load %arg1[%c0, %c0_0, %c0_1] : memref<1x256x4xf32, #tpu.memory_space<vmem>>, vector<1x256x4xf32>
    %1 = vector.shape_cast %0 : vector<1x256x4xf32> to vector<256x4xf32>
    %c0_2 = arith.constant 0 : index
    %c0_3 = arith.constant 0 : index
    %2 = vector.load %arg3[%c0_2, %c0_3] : memref<4x128xf32, #tpu.memory_space<vmem>>, vector<4x128xf32>
    %cst = arith.constant dense<0.000000e+00> : vector<256x128xf32>
    %3 = tpu.matmul %1, %2, %cst {dimension_numbers = #tpu.dot_dimension_numbers<[1], [0], [0], [1], [0, 0, 1, 1], [], []>} : vector<256x4xf32>, vector<4x128xf32>, vector<256x128xf32> -> vector<256x128xf32>
    %c0_4 = arith.constant 0 : index
    %c0_5 = arith.constant 0 : index
    %4 = vector.load %arg4[%c0_4, %c0_5] : memref<1x128xf32, #tpu.memory_space<vmem>>, vector<1x128xf32>
    %5 = vector.broadcast %4 : vector<1x128xf32> to vector<256x128xf32>
    %6 = arith.addf %3, %5 : vector<256x128xf32>
    %c0_6 = arith.constant 0 : index
    %c0_7 = arith.constant 0 : index
    %7 = vector.load %arg11[%c0_6, %c0_7] : memref<256x128xf32, #tpu.memory_space<vmem>>, vector<256x128xf32>
    tpu.vector_store %arg11[%c0_6, %c0_7], %6 {strides = array<i32>} : memref<256x128xf32, #tpu.memory_space<vmem>>, vector<256x128xf32>,
    %c0_8 = arith.constant 0 : index
    %c0_9 = arith.constant 0 : index
    %c0_10 = arith.constant 0 : index
    %8 = vector.load %arg2[%c0_8, %c0_9, %c0_10] : memref<1x1x256xi32, #tpu.memory_space<vmem>>, vector<1x1x256xi32>
    %9 = vector.shape_cast %8 : vector<1x1x256xi32> to vector<1x256xi32>
    %10 = tpu.iota {dimensions = array<i32: 0>} : vector<8x256xi32>
    %c1_i32 = arith.constant 1 : i32
    %11 = vector.broadcast %c1_i32 : i32 to vector<8x256xi32>
    %12 = arith.addi %10, %11 : vector<8x256xi32>
    %13 = vector.broadcast %9 : vector<1x256xi32> to vector<8x256xi32>
    %14 = arith.cmpi eq, %13, %12 : vector<8x256xi32>
    %15 = arith.extui %14 : vector<8x256xi1> to vector<8x256xi32>
    %16 = arith.sitofp %15 : vector<8x256xi32> to vector<8x256xf32>
    %cst_11 = arith.constant dense<0.000000e+00> : vector<8xf32>
    %17 = vector.multi_reduction <add>, %16, %cst_11 [1] : vector<8x256xf32> to vector<8xf32>
    %18 = vector.shape_cast %17 : vector<8xf32> to vector<8x1xf32>
    %c0_12 = arith.constant 0 : index
    %c0_13 = arith.constant 0 : index
    %19 = vector.load %arg11[%c0_12, %c0_13] : memref<256x128xf32, #tpu.memory_space<vmem>>, vector<256x128xf32>
    %cst_14 = arith.constant dense<0.000000e+00> : vector<8x128xf32>
    %20 = tpu.matmul %16, %19, %cst_14 {dimension_numbers = #tpu.dot_dimension_numbers<[1], [0], [0], [1], [0, 0, 1, 1], [], []>} : vector<8x256xf32>, vector<256x128xf32>, vector<8x128xf32> -> vector<8x128xf32>
    %cst_15 = arith.constant 0.000000e+00 : f32
    %21 = vector.broadcast %cst_15 : f32 to vector<8x1xf32>
    %22 = arith.cmpf ogt, %18, %21 : vector<8x1xf32>
    %cst_16 = arith.constant 1.000000e+00 : f32
    %23 = vector.broadcast %cst_16 : f32 to vector<8x1xf32>
    %24 = arith.maximumf %18, %23 : vector<8x1xf32>
    %25 = vector.broadcast %24 : vector<8x1xf32> to vector<8x128xf32>
    %26 = arith.divf %20, %25 : vector<8x128xf32>
    %cst_17 = arith.constant 0.000000e+00 : f32
    %27 = vector.shape_cast %22 : vector<8x1xi1> to vector<8x1xi1>
    %28 = vector.broadcast %27 : vector<8x1xi1> to vector<8x128xi1>
    %29 = vector.broadcast %cst_17 : f32 to vector<8x128xf32>
    %30 = arith.select %28, %26, %29 : vector<8x128xi1>, vector<8x128xf32>
    %c0_18 = arith.constant 0 : index
    %c0_19 = arith.constant 0 : index
    %31 = vector.load %arg5[%c0_18, %c0_19] : memref<128x512xf32, #tpu.memory_space<vmem>>, vector<128x512xf32>
    %cst_20 = arith.constant dense<0.000000e+00> : vector<8x512xf32>
    %32 = tpu.matmul %30, %31, %cst_20 {dimension_numbers = #tpu.dot_dimension_numbers<[1], [0], [0], [1], [0, 0, 1, 1], [], []>} : vector<8x128xf32>, vector<128x512xf32>, vector<8x512xf32> -> vector<8x512xf32>
    %c0_21 = arith.constant 0 : index
    %c0_22 = arith.constant 0 : index
    %33 = vector.load %arg6[%c0_21, %c0_22] : memref<1x512xf32, #tpu.memory_space<vmem>>, vector<1x512xf32>
    %34 = vector.broadcast %33 : vector<1x512xf32> to vector<8x512xf32>
    %35 = arith.addf %32, %34 : vector<8x512xf32>
    %cst_23 = arith.constant 0.000000e+00 : f32
    %36 = vector.broadcast %cst_23 : f32 to vector<8x512xf32>
    %37 = arith.maximumf %35, %36 : vector<8x512xf32>
    %c0_24 = arith.constant 0 : index
    %c0_25 = arith.constant 0 : index
    %38 = vector.load %arg7[%c0_24, %c0_25] : memref<1x512xf32, #tpu.memory_space<vmem>>, vector<1x512xf32>
    %39 = vector.broadcast %38 : vector<1x512xf32> to vector<8x512xf32>
    %40 = arith.mulf %37, %39 : vector<8x512xf32>
    %cst_26 = arith.constant dense<0.000000e+00> : vector<8xf32>
    %41 = vector.multi_reduction <add>, %40, %cst_26 [1] : vector<8x512xf32> to vector<8xf32>
    %42 = vector.shape_cast %41 : vector<8xf32> to vector<8x1xf32>
    %cst_27 = arith.constant dense<0xFF800000> : vector<1xf32>
    %43 = vector.multi_reduction <maximumf>, %42, %cst_27 [0] : vector<8x1xf32> to vector<1xf32>
    %44 = vector.shape_cast %43 : vector<1xf32> to vector<1x1xf32>
    %45 = vector.broadcast %44 : vector<1x1xf32> to vector<8x1xf32>
    %46 = arith.subf %42, %45 : vector<8x1xf32>
    %47 = math.exp %46 : vector<8x1xf32>
    %cst_28 = arith.constant dense<0.000000e+00> : vector<1xf32>
    %48 = vector.multi_reduction <add>, %47, %cst_28 [0] : vector<8x1xf32> to vector<1xf32>
    %49 = vector.shape_cast %48 : vector<1xf32> to vector<1x1xf32>
    %50 = vector.broadcast %49 : vector<1x1xf32> to vector<8x1xf32>
    %51 = arith.divf %47, %50 : vector<8x1xf32>
    %c0_29 = arith.constant 0 : index
    %c0_30 = arith.constant 0 : index
    %52 = vector.load %arg8[%c0_29, %c0_30] : memref<128x128xf32, #tpu.memory_space<vmem>>, vector<128x128xf32>
    %cst_31 = arith.constant dense<0.000000e+00> : vector<8x128xf32>
    %53 = tpu.matmul %30, %52, %cst_31 {dimension_numbers = #tpu.dot_dimension_numbers<[1], [0], [0], [1], [0, 0, 1, 1], [], []>} : vector<8x128xf32>, vector<128x128xf32>, vector<8x128xf32> -> vector<8x128xf32>
    %c0_32 = arith.constant 0 : index
    %c0_33 = arith.constant 0 : index
    %54 = vector.load %arg9[%c0_32, %c0_33] : memref<1x128xf32, #tpu.memory_space<vmem>>, vector<1x128xf32>
    %55 = vector.broadcast %54 : vector<1x128xf32> to vector<8x128xf32>
    %56 = arith.addf %53, %55 : vector<8x128xf32>
    %57 = vector.broadcast %51 : vector<8x1xf32> to vector<8x128xf32>
    %58 = arith.mulf %56, %57 : vector<8x128xf32>
    %cst_34 = arith.constant dense<0.000000e+00> : vector<128xf32>
    %59 = vector.multi_reduction <add>, %58, %cst_34 [0] : vector<8x128xf32> to vector<128xf32>
    %60 = vector.shape_cast %59 : vector<128xf32> to vector<1x128xf32>
    %c0_35 = arith.constant 0 : index
    %c0_36 = arith.constant 0 : index
    %c0_37 = arith.constant 0 : index
    %61 = vector.load %arg10[%c0_35, %c0_36, %c0_37] : memref<1x1x128xf32, #tpu.memory_space<vmem>>, vector<1x1x128xf32>
    %62 = vector.shape_cast %61 : vector<1x1x128xf32> to vector<1x128xf32>
    %63 = vector.shape_cast %60 : vector<1x128xf32> to vector<1x1x128xf32>
    tpu.vector_store %arg10[%c0_35, %c0_36, %c0_37], %63 {strides = array<i32>} : memref<1x1x128xf32, #tpu.memory_space<vmem>>, vector<1x1x128xf32>,
    return
  }
  func.func @transform_0(%arg0: i32) -> (i32, i32, i32) {
    %c0_i32 = arith.constant 0 : i32
    %c0_i32_0 = arith.constant 0 : i32
    %c0_i32_1 = arith.constant 0 : i32
    return %arg0, %c0_i32, %c0_i32_0 : i32, i32, i32
  }
  func.func @transform_1(%arg0: i32) -> (i32, i32, i32) {
    %c0_i32 = arith.constant 0 : i32
    %c0_i32_0 = arith.constant 0 : i32
    %c0_i32_1 = arith.constant 0 : i32
    return %arg0, %c0_i32, %c0_i32_0 : i32, i32, i32
  }
  func.func @transform_2(%arg0: i32) -> (i32, i32) {
    %c0_i32 = arith.constant 0 : i32
    %c0_i32_0 = arith.constant 0 : i32
    %c0_i32_1 = arith.constant 0 : i32
    return %c0_i32, %c0_i32_0 : i32, i32
  }
  func.func @transform_3(%arg0: i32) -> (i32, i32) {
    %c0_i32 = arith.constant 0 : i32
    %c0_i32_0 = arith.constant 0 : i32
    %c0_i32_1 = arith.constant 0 : i32
    return %c0_i32, %c0_i32_0 : i32, i32
  }
  func.func @transform_4(%arg0: i32) -> (i32, i32) {
    %c0_i32 = arith.constant 0 : i32
    %c0_i32_0 = arith.constant 0 : i32
    %c0_i32_1 = arith.constant 0 : i32
    return %c0_i32, %c0_i32_0 : i32, i32
  }
  func.func @transform_5(%arg0: i32) -> (i32, i32) {
    %c0_i32 = arith.constant 0 : i32
    %c0_i32_0 = arith.constant 0 : i32
    %c0_i32_1 = arith.constant 0 : i32
    return %c0_i32, %c0_i32_0 : i32, i32
  }
  func.func @transform_6(%arg0: i32) -> (i32, i32) {
    %c0_i32 = arith.constant 0 : i32
    %c0_i32_0 = arith.constant 0 : i32
    %c0_i32_1 = arith.constant 0 : i32
    return %c0_i32, %c0_i32_0 : i32, i32
  }
  func.func @transform_7(%arg0: i32) -> (i32, i32) {
    %c0_i32 = arith.constant 0 : i32
    %c0_i32_0 = arith.constant 0 : i32
    %c0_i32_1 = arith.constant 0 : i32
    return %c0_i32, %c0_i32_0 : i32, i32
  }
  func.func @transform_8(%arg0: i32) -> (i32, i32) {
    %c0_i32 = arith.constant 0 : i32
    %c0_i32_0 = arith.constant 0 : i32
    %c0_i32_1 = arith.constant 0 : i32
    return %c0_i32, %c0_i32_0 : i32, i32
  }
  func.func @transform_9(%arg0: i32) -> (i32, i32, i32) {
    %c0_i32 = arith.constant 0 : i32
    %c0_i32_0 = arith.constant 0 : i32
    %c0_i32_1 = arith.constant 0 : i32
    return %arg0, %c0_i32, %c0_i32_0 : i32, i32, i32
  }
}

</mosaic_0001>

<bundles_post_ra>
// kernel: tpu_custom_call.1
= control target key start
LH: loop header
LB: loop body
LE: loop exit
PB: predicated region body
PF: predicated region fallthrough
CT: control target
= control target key end

     0   :  { %14 = vsyncpa [#allocation4], 0  ;;  %s1830_s0 = inlined_call_operand.vmem [shape: f32[2,256,4], index: 0, kind: input, shape index: {}]   ;;  %s1831_s1 = inlined_call_operand.vmem [shape: s32[2,1,256], index: 1, kind: input, shape index: {}]   ;;  %s1832_s2 = inlined_call_operand.vmem [shape: f32[4,128], index: 2, kind: input, shape index: {}]   ;;  %s1833_s3 = inlined_call_operand.vmem [shape: f32[1,128], index: 3, kind: input, shape index: {}]   ;;  %s1834_s4 = inlined_call_operand.vmem [shape: f32[128,512], index: 4, kind: input, shape index: {}]   ;;  %s1835_s5 = inlined_call_operand.vmem [shape: f32[1,512], index: 5, kind: input, shape index: {}]   ;;  %s1836_s6 = inlined_call_operand.vmem [shape: f32[1,512], index: 6, kind: input, shape index: {}]   ;;  %s1837_s7 = inlined_call_operand.hbm [shape: f32[128,128], index: 7, kind: input, shape index: {}]   ;;  %s1838_s8 = inlined_call_operand.vmem [shape: f32[1,128], index: 8, kind: input, shape index: {}]   ;;  %s1839_s9 = inlined_call_operand.hbm [shape: f32[2,1,128], index: 9, kind: output, shape index: {}]  }
   0x1   :  { %15 = vsyncpa [#allocation5], 0 }
   0x2   :  { %17 = vsyncpa [#allocation5 + $0x1], 0  ;;  %s1372_s30 = smov 0   ;;  %s1374_s10 = smov 0  }
   0x3   :  { %s1376_s11 = smov 0   ;;  %s1378_s12 = smov 0  }
   0x4 LB: > { %s1393_s13 = sadd.s32 4294967295, %s1315_s12   ;;  %s1101_s14 = sadd.s32 4294967294, %s1315_s12   ;;  %s1315_s12 = sphi %s1378_s12, %s1849_s12   ;;  %s1311_s11 = sphi %s1376_s11, %s1848_s11   ;;  %s1307_s10 = sphi %s1374_s10, %s1847_s10   ;;  %s1303_s30 = sphi %s1372_s30, %s1846_s30  }
   0x5   : > { %s1397_s15 = sadd.s32 1, %s1315_s12   ;;  %s229_s16 = sadd.s32 1, %s1311_s11 }
   0x6   : > { %s226_s17 = ssub.s32 %s1315_s12, %s1397_s15  ;;  %p239_p0 = scmp.ne.s32.totalorder %s1311_s11, %s1307_s10 }
   0x7   : > { %p227_p1 = scmp.eq.s32.totalorder %s226_s17, 0  ;;  %p240_p2 = scmp.eq.s32.totalorder %s1393_s13, 1 }
   0x8   : > { %p245_p3 = scmp.ne.s32.totalorder %s1307_s10, %s1303_s30  ;;  %p246_p4 = scmp.eq.s32.totalorder %s1101_s14, 1 }
   0x9   : > { %s1408_s18 = scalar_select %p227_p1, %s1311_s11, %s229_s16  }
   0xa   : > { %p1410_p5 = por %p240_p2, %p239_p0  ;;  %p1414_p6 = por %p246_p4, %p245_p3 }
   0xb   : > { %p1102_p7 = scmp.ge.s32.totalorder %s1315_s12, 1  ;;  %p253_p8 = scmp.lt.s32.totalorder %s1315_s12, 3 }
   0xc   : > { %p1171_p9 = scmp.eq.s32.totalorder %s1393_s13, 0  ;;  %s279_s23 = sshll.u32 %s1837_s7, 4  ;;  %s280_s23 = int_to_ptr.hbm [resolvable:$true] %s279_s23 }
   0xd   : > { %p254_p10 = pnand %p1102_p7, %p253_p8  ;;  %s1317_s24 = smov [#allocation3]  }
   0xe   : > { %s281_s25 = sshll.u32 %s1317_s24, 4  ;;  %s1318_s26 = smov 128   ;;  %s282_s25 = int_to_ptr.vmem [resolvable:$true] %s281_s25 }
   0xf   : > { %p1163_p11 = pneg %p254_p10  ;;  %s1319_s27 = smov 8  }
  0x10   : > { %315 = sbr.rel (%p254_p10) target bundleno = 763 (0x2fb), region = 56 }
  0x11   : > { %p1164_p12 = pnand %p1171_p9, %p1163_p11 }
  0x13   : > { %1166 = dma.hbm_to_vmem [thread:$0]  (!%p1164_p12), %s280_s23, 2048, %s282_s25, [#allocation4], %s1318_s26, %s1318_s26, %s1319_s27  }
  0x15   : > { %1294 = dma.done.wait (%p1171_p9), [#allocation4], 2048  }
  0x16   : > { %1296 = vsyncadd (%p1171_p9), [#allocation4], 4294965248  ;;  %p355_p13 = scmp.lt.s32.totalorder %s1393_s13, 1  ;;  %vm498_vm0 = vcmask 1043456   ;;  %vm401_vm1 = vcmask 31744   ;;  %s353_s16 = sand.u32 1, %s1307_s10  }
  0x17   : > { %v396_v0 = vld [vmem:[%s1832_s2] sm:$0xf]  ;;  %s1018_s22 = scalar_lea.hbm %s1839_s9, %s1393_s13  ;;  %s354_s23 = scalar_lea.vmem [#allocation6], %s353_s16 }
  0x18   : > { %s1432_s28 = scalar_select %p355_p13, %s1393_s13, 1  ;;  %1110 = vmatpush.msk.msra.mxu0 %vm498_vm0, %v396_v0  ;;  %1156 = vmatpush.msk.msra.mxu3 %vm498_vm0, %v396_v0  ;;  %v1512_v35 = vld [vmem:[%s1833_s3] ss:$0 sm:$0xff] }
  0x19   : > { %1155 = vmatpush.msk.msra.mxu2 %vm498_vm0, %v396_v0  ;;  %s1020_s24 = sshll.u32 %s354_s23, 4  ;;  %s1010_s26 = scalar_lea.sflag [#allocation5], %s353_s16  ;;  %s1021_s24 = int_to_ptr.vmem [resolvable:$true] %s1020_s24 }
  0x1a   : > { %s1154_s29 = sshll.u32 %s1432_s28, 8  ;;  %s1109_s25 = sshll.u32 %s1432_s28, 1 }
  0x1b   : > { %s1438_s17 = scalar_lea.vmem %s1830_s0, %s1154_s29  ;;  %s363_s29 = scalar_lea.vmem %s1831_s1, %s1109_s25 }
  0x1c   : > { %v364_v1 = vld [vmem:[%s1438_s17] sm:$0xff]  ;;  %v379_v3 = vld [vmem:[%s1438_s17 + $0x78] sm:$0xff]  ;;  %v365_v4 = vld [vmem:[%s1438_s17 + $0x8] sm:$0xff]  ;;  %s1022_s25 = sshll.u32 %s1018_s22, 4  ;;  %s1269_s13 = scalar_lea.hbm %s1839_s9, 2  ;;  %s1023_s25 = int_to_ptr.hbm [resolvable:$true] %s1022_s25 }
  0x1d   : > { %v388_v2 = vld [vmem:[%s1438_s17 + $0xc0] sm:$0xff]  ;;  %1111 = vmatmul.msk.f32.vlgmr.msra.gmra.mxu0 %vm401_vm1, %v364_v1  ;;  %1126 = vmatmul.msk.f32.vlgmr.msra.gmra.mxu2 %vm401_vm1, %v379_v3  ;;  %v389_v5 = vld [vmem:[%s1438_s17 + $0xc8] sm:$0xff]  ;;  %v366_v7 = vld [vmem:[%s1438_s17 + $0x10] sm:$0xff]  ;;  %s1263_s27 = sshra.s32 %s1023_s25, 4  ;;  %s1264_s27 = int_to_ptr.hbm [resolvable:$true] %s1263_s27 }
  0x1e   : > { %1135 = vmatmul.msk.f32.vlgmr.msra.gmra.mxu3 %vm401_vm1, %v388_v2  ;;  %v380_v6 = vld [vmem:[%s1438_s17 + $0x80] sm:$0xff]  ;;  %v390_v8 = vld [vmem:[%s1438_s17 + $0xd0] sm:$0xff]  ;;  %v381_v9 = vld [vmem:[%s1438_s17 + $0x88] sm:$0xff]  ;;  %p1270_p3 = scmp.lt.s32.totalorder %s1264_s27, %s1839_s9 }
  0x1f   : > { %v367_v10 = vld [vmem:[%s1438_s17 + $0x18] sm:$0xff]  ;;  %v382_v12 = vld [vmem:[%s1438_s17 + $0x90] sm:$0xff]  ;;  %v368_v13 = vld [vmem:[%s1438_s17 + $0x20] sm:$0xff] }
  0x20   : > { %v391_v11 = vld [vmem:[%s1438_s17 + $0xd8] sm:$0xff]  ;;  %v392_v14 = vld [vmem:[%s1438_s17 + $0xe0] sm:$0xff]  ;;  %v369_v16 = vld [vmem:[%s1438_s17 + $0x28] sm:$0xff] }
  0x21   : > { %v383_v15 = vld [vmem:[%s1438_s17 + $0x98] sm:$0xff]  ;;  %v393_v17 = vld [vmem:[%s1438_s17 + $0xe8] sm:$0xff]  ;;  %v384_v18 = vld [vmem:[%s1438_s17 + $0xa0] sm:$0xff] }
  0x22   : > { %v370_v19 = vld [vmem:[%s1438_s17 + $0x30] sm:$0xff]  ;;  %v385_v21 = vld [vmem:[%s1438_s17 + $0xa8] sm:$0xff]  ;;  %v371_v22 = vld [vmem:[%s1438_s17 + $0x38] sm:$0xff] }
  0x23   : > { %v394_v20 = vld [vmem:[%s1438_s17 + $0xf0] sm:$0xff]  ;;  %v395_v23 = vld [vmem:[%s1438_s17 + $0xf8] sm:$0xff]  ;;  %v372_v25 = vld [vmem:[%s1438_s17 + $0x40] sm:$0xff] }
  0x24   : > { %v386_v24 = vld [vmem:[%s1438_s17 + $0xb0] sm:$0xff]  ;;  %v387_v26 = vld [vmem:[%s1438_s17 + $0xb8] sm:$0xff]  ;;  %v373_v27 = vld [vmem:[%s1438_s17 + $0x48] sm:$0xff] }
  0x25   : > { %1112 = vmatmul.msk.f32.gmra.mxu0 %vm401_vm1, %v365_v4  ;;  %1127 = vmatmul.msk.f32.gmra.mxu2 %vm401_vm1, %v380_v6  ;;  %v374_v28 = vld [vmem:[%s1438_s17 + $0x50] sm:$0xff]  ;;  %v375_v29 = vld [vmem:[%s1438_s17 + $0x58] sm:$0xff]  ;;  %v376_v30 = vld [vmem:[%s1438_s17 + $0x60] sm:$0xff] }
  0x26   : > { %1136 = vmatmul.msk.f32.gmra.mxu3 %vm401_vm1, %v389_v5  ;;  %v377_v31 = vld [vmem:[%s1438_s17 + $0x68] sm:$0xff]  ;;  %v378_v32 = vld [vmem:[%s1438_s17 + $0x70] sm:$0xff] }
  0x2d   : > { %1113 = vmatmul.msk.f32.gmra.mxu0 %vm401_vm1, %v366_v7  ;;  %1128 = vmatmul.msk.f32.gmra.mxu2 %vm401_vm1, %v381_v9 }
  0x2e   : > { %1137 = vmatmul.msk.f32.gmra.mxu3 %vm401_vm1, %v390_v8 }
  0x35   : > { %1114 = vmatmul.msk.f32.gmra.mxu0 %vm401_vm1, %v367_v10  ;;  %1129 = vmatmul.msk.f32.gmra.mxu2 %vm401_vm1, %v382_v12  ;;  %v648_v10 = vlaneseq }
  0x36   : > { %1138 = vmatmul.msk.f32.gmra.mxu3 %vm401_vm1, %v391_v11 }
  0x37   : > { %v649_v12 = vshrl.u32 %v648_v10, 7  ;;  %v812_v10 = vld [vmem:[%s1834_s4 + $0x1d0] sm:$0xff] }
  0x3d   : > { %1115 = vmatmul.msk.f32.gmra.mxu0 %vm401_vm1, %v368_v13  ;;  %1130 = vmatmul.msk.f32.gmra.mxu2 %vm401_vm1, %v383_v15  ;;  %v650_v15 = vadd.s32 1, %v649_v12  ;;  %v762_v12 = vld [vmem:[%s1834_s4 + $0x40] sm:$0xff] }
  0x3e   : > { %1139 = vmatmul.msk.f32.gmra.mxu3 %vm401_vm1, %v392_v14  ;;  %v647_v14 = vld [vmem:[%s363_s29] sm:$0x3]  ;;  %s1265_s29 = scalar_lea.hbm %s1264_s27, 1 }
  0x3f   : > { %p1266_p0 = scmp.ne.s32.totalorder %s1264_s27, %s1265_s29  ;;  %p1271_p4 = scmp.lt.s32.totalorder %s1269_s13, %s1265_s29 }
  0x41   : > { %p1267_p1 = pnand %p1266_p0, %p1410_p5  ;;  %p1272_p7 = por %p1271_p4, %p1270_p3 }
  0x43   : > { %p1268_p2 = pneg %p1267_p1 }
  0x45   : > { %1116 = vmatmul.msk.f32.gmra.mxu0 %vm401_vm1, %v369_v16  ;;  %1131 = vmatmul.msk.f32.gmra.mxu2 %vm401_vm1, %v384_v18  ;;  %v651_v16 = vperm.slane %v647_v14, 0  ;;  %p1273_p8 = pnand %p1272_p7, %p1268_p2 }
  0x46   : > { %1140 = vmatmul.msk.f32.gmra.mxu3 %vm401_vm1, %v393_v17  ;;  %v652_v17 = vperm.slane %v647_v14, 1  ;;  %v804_v14 = vld [vmem:[%s1834_s4 + $0x190] sm:$0xff] }
  0x47   : > { %vm1552_vm2 = vcmp.eq.s32.totalorder %v651_v16, %v650_v15  ;;  %v759_v16 = vld [vmem:[%s1834_s4 + $0x28] sm:$0xff] }
  0x48   : > { %vm1556_vm3 = vcmp.eq.s32.totalorder %v652_v17, %v650_v15  ;;  %v758_v15 = vld [vmem:[%s1834_s4 + $0x20] sm:$0xff]  ;;  %v800_v17 = vld [vmem:[%s1834_s4 + $0x170] sm:$0xff] }
  0x4d   : > { %1117 = vmatmul.msk.f32.gmra.mxu0 %vm401_vm1, %v370_v19  ;;  %1132 = vmatmul.msk.f32.gmra.mxu2 %vm401_vm1, %v385_v21  ;;  %v755_v19 = vld [vmem:[%s1834_s4 + $0x8] sm:$0xff] }
  0x4e   : > { %1141 = vmatmul.msk.f32.gmra.mxu3 %vm401_vm1, %v394_v20  ;;  %v817_v20 = vld [vmem:[%s1834_s4 + $0x1f8] sm:$0xff] }
  0x55   : > { %1118 = vmatmul.msk.f32.gmra.mxu0 %vm401_vm1, %v371_v22  ;;  %1133 = vmatmul.msk.f32.gmra.mxu2 %vm401_vm1, %v386_v24  ;;  %v1320_v22 = vmov 0.0  }
  0x56   : > { %1142 = vmatmul.msk.f32.gmra.mxu3 %vm401_vm1, %v395_v23  ;;  %v1143_v23 = vsel %vm1552_vm2, 1.0, %v1320_v22  ;;  %v1144_v24 = vsel %vm1556_vm3, 1.0, %v1320_v22  ;;  %v796_v22 = vld [vmem:[%s1834_s4 + $0x150] sm:$0xff] }
  0x5d   : > { %1119 = vmatmul.msk.f32.gmra.mxu0 %vm401_vm1, %v372_v25  ;;  %1134 = vmatmul.msk.f32.gmra.mxu2 %vm401_vm1, %v387_v26  ;;  %v659_v25 = vadd.f32 %v1144_v24, %v1143_v23  ;;  %v813_v23 = vld [vmem:[%s1834_s4 + $0x1d8] sm:$0xff]  ;;  %v975_v24 = vld [vmem:[#allocation3 + $0x70] sm:$0xff] }
  0x5f   : > { %660 = vadd.xlane.f32.xlu0 %v659_v25  ;;  %v792_v25 = vld [vmem:[%s1834_s4 + $0x130] sm:$0xff] }
  0x65   : > { %1120 = vmatmul.msk.f32.gmra.mxu0 %vm401_vm1, %v373_v27 }
  0x6d   : > { %1121 = vmatmul.msk.f32.gmra.mxu0 %vm401_vm1, %v374_v28 }
  0x75   : > { %1122 = vmatmul.msk.f32.gmra.mxu0 %vm401_vm1, %v375_v29 }
  0x7d   : > { %1123 = vmatmul.msk.f32.gmra.mxu0 %vm401_vm1, %v376_v30  ;;  %v1321_v30 = vmov 1.0  }
  0x85   : > { %1124 = vmatmul.msk.f32.gmra.mxu0 %vm401_vm1, %v377_v31 }
  0x8d   : > { %1125 = vmatmul.msk.f32.gmra.mxu0 %vm401_vm1, %v378_v32  ;;  %v814_v32 = vld [vmem:[%s1834_s4 + $0x1e0] sm:$0xff] }
  0x8e   : > { %828 = vmatpush.msrb.mxu3 %v814_v32  ;;  %v801_v32 = vld [vmem:[%s1834_s4 + $0x178] sm:$0xff] }
  0x9a   : > { %v1507_v33 = vpop.f32.mrf.mxu0 }
  0xa0   : > { %v564_v37 = vpop.f32.mrf.mxu2 }
  0xa1   : > { %v591_v34 = vpop.f32.mrf.mxu3  ;;  %v565_v38 = vadd.f32 %v1512_v35, %v564_v37 }
  0xa2   : > { %v1514_v36 = vpop.f32.mrf.mxu0  ;;  %v592_v5 = vadd.f32 %v1512_v35, %v591_v34  ;;  %v810_v34 = vld [vmem:[%s1834_s4 + $0x1c0] sm:$0xff] }
  0xa3   : > { %694 = vmatpush.msra.mxu1 %v565_v38  ;;  %v806_v38 = vld [vmem:[%s1834_s4 + $0x1a0] sm:$0xff]  ;;  %829 = vmatpush.msrb.mxu3 %v810_v34  ;;  %v972_v34 = vld [vmem:[#allocation3 + $0x58] sm:$0xff] }
  0xa5   : > { %830 = vmatpush.msrb.mxu3 %v806_v38  ;;  %v797_v38 = vld [vmem:[%s1834_s4 + $0x158] sm:$0xff] }
  0xa8   : > { %v1519_v41 = vpop.f32.mrf.mxu2 }
  0xa9   : > { %v594_v39 = vpop.f32.mrf.mxu3  ;;  %v568_v27 = vadd.f32 %v1512_v35, %v1519_v41  ;;  %v802_v41 = vld [vmem:[%s1834_s4 + $0x180] sm:$0xff] }
  0xaa   : > { %v1517_v40 = vpop.f32.mrf.mxu0  ;;  %v595_v4 = vadd.f32 %v1512_v35, %v594_v39  ;;  %831 = vmatpush.msrb.mxu3 %v802_v41  ;;  %v776_v41 = vld [vmem:[%s1834_s4 + $0xb0] sm:$0xff] }
  0xb0   : > { %v570_v44 = vpop.f32.mrf.mxu2 }
  0xb1   : > { %v597_v42 = vpop.f32.mrf.mxu3  ;;  %v571_v26 = vadd.f32 %v1512_v35, %v570_v44  ;;  %v798_v44 = vld [vmem:[%s1834_s4 + $0x160] sm:$0xff] }
  0xb2   : > { %v1521_v43 = vpop.f32.mrf.mxu0  ;;  %v598_v2 = vadd.f32 %v1512_v35, %v597_v42  ;;  %832 = vmatpush.msrb.mxu3 %v798_v44  ;;  %v970_v44 = vld [vmem:[#allocation3 + $0x48] sm:$0xff] }
  0xb8   : > { %v573_v47 = vpop.f32.mrf.mxu2 }
  0xb9   : > { %v600_v45 = vpop.f32.mrf.mxu3  ;;  %v574_v21 = vadd.f32 %v1512_v35, %v573_v47 }
  0xba   : > { %v1523_v46 = vpop.f32.mrf.mxu0  ;;  %v601_v0 = vadd.f32 %v1512_v35, %v600_v45 }
  0xc0   : > { %v576_v50 = vpop.f32.mrf.mxu2 }
  0xc1   : > { %v603_v48 = vpop.f32.mrf.mxu3  ;;  %v577_v13 = vadd.f32 %v1512_v35, %v576_v50 }
  0xc2   : > { %v1525_v49 = vpop.f32.mrf.mxu0  ;;  %v604_v63 = vadd.f32 %v1512_v35, %v603_v48  ;;  %v794_v48 = vld [vmem:[%s1834_s4 + $0x140] sm:$0xff] }
  0xc3   : > { %833 = vmatpush.msrb.mxu3 %v794_v48  ;;  %v969_v48 = vld [vmem:[#allocation3 + $0x40] sm:$0xff] }
  0xc8   : > { %v579_v53 = vpop.f32.mrf.mxu2 }
  0xc9   : > { %v606_v51 = vpop.f32.mrf.mxu3  ;;  %v580_v11 = vadd.f32 %v1512_v35, %v579_v53 }
  0xca   : > { %v1527_v52 = vpop.f32.mrf.mxu0  ;;  %v607_v62 = vadd.f32 %v1512_v35, %v606_v51  ;;  %v790_v51 = vld [vmem:[%s1834_s4 + $0x120] sm:$0xff] }
  0xcb   : > { %834 = vmatpush.msrb.mxu3 %v790_v51  ;;  %v785_v51 = vld [vmem:[%s1834_s4 + $0xf8] sm:$0xff] }
  0xd0   : > { %v582_v56 = vpop.f32.mrf.mxu2 }
  0xd1   : > { %v609_v54 = vpop.f32.mrf.mxu3  ;;  %v583_v9 = vadd.f32 %v1512_v35, %v582_v56 }
  0xd2   : > { %v1529_v55 = vpop.f32.mrf.mxu0  ;;  %v610_v58 = vadd.f32 %v1512_v35, %v609_v54  ;;  %v786_v54 = vld [vmem:[%s1834_s4 + $0x100] sm:$0xff] }
  0xd3   : > { %v541_v56 = vadd.f32 %v1512_v35, %v1529_v55  ;;  %835 = vmatpush.msrb.mxu3 %v786_v54  ;;  %v532_v55 = vadd.f32 %v1512_v35, %v1523_v46  ;;  %v815_v46 = vld [vmem:[%s1834_s4 + $0x1e8] sm:$0xff]  ;;  %v661_v54 = vpop.xlane.xlu0 %660 }
  0xd4   : > { %vm734_vm8 = vcmp.gt.f32.partialorder %v661_v54, 0.0 }
  0xd8   : > { %v585_v61 = vpop.f32.mrf.mxu2 }
  0xd9   : > { %v612_v57 = vpop.f32.mrf.mxu3  ;;  %v586_v7 = vadd.f32 %v1512_v35, %v585_v61  ;;  %v529_v61 = vadd.f32 %v1512_v35, %v1521_v43  ;;  %v795_v43 = vld [vmem:[%s1834_s4 + $0x148] sm:$0xff] }
  0xda   : > { %v613_v59 = vadd.f32 %v1512_v35, %v612_v57  ;;  %v1533_v60 = vpop.f32.mrf.mxu0  ;;  %v782_v57 = vld [vmem:[%s1834_s4 + $0xe0] sm:$0xff] }
  0xdb   : > { %v544_v53 = vadd.f32 %v1512_v35, %v1533_v60  ;;  %836 = vmatpush.msrb.mxu3 %v782_v57  ;;  %v535_v60 = vadd.f32 %v1512_v35, %v1525_v49  ;;  %v520_v49 = vadd.f32 %v1512_v35, %v1507_v33  ;;  %v803_v33 = vld [vmem:[%s1834_s4 + $0x188] sm:$0xff]  ;;  %v781_v57 = vld [vmem:[%s1834_s4 + $0xd8] sm:$0xff] }
  0xdc   : > { %714 = vmatpush.msrb.mxu2 %v613_v59  ;;  %v778_v59 = vld [vmem:[%s1834_s4 + $0xc0] sm:$0xff] }
  0xdd   : > { %837 = vmatpush.msrb.mxu3 %v778_v59  ;;  %v760_v59 = vld [vmem:[%s1834_s4 + $0x30] sm:$0xff] }
  0xde   : > { %715 = vmatpush.msrb.mxu2 %v610_v58  ;;  %v538_v58 = vadd.f32 %v1512_v35, %v1527_v52  ;;  %v526_v52 = vadd.f32 %v1512_v35, %v1517_v40  ;;  %v811_v40 = vld [vmem:[%s1834_s4 + $0x1c8] sm:$0xff] }
  0xe0   : > { %716 = vmatpush.msrb.mxu2 %v607_v62  ;;  %v588_v3 = vpop.f32.mrf.mxu2  ;;  %v523_v62 = vadd.f32 %v1512_v35, %v1514_v36  ;;  %v807_v36 = vld [vmem:[%s1834_s4 + $0x1a8] sm:$0xff] }
  0xe1   : > { %v589_v6 = vadd.f32 %v1512_v35, %v588_v3  ;;  %v774_v3 = vld [vmem:[%s1834_s4 + $0xa0] sm:$0xff] }
  0xe2   : > { %717 = vmatpush.msrb.mxu2 %v604_v63  ;;  %v1538_v1 = vpop.f32.mrf.mxu0  ;;  %v791_v63 = vld [vmem:[%s1834_s4 + $0x128] sm:$0xff]  ;;  %838 = vmatpush.msrb.mxu3 %v774_v3 }
  0xe3   : > { %v547_v50 = vadd.f32 %v1512_v35, %v1538_v1  ;;  %v783_v1 = vld [vmem:[%s1834_s4 + $0xe8] sm:$0xff] }
  0xe4   : > { %718 = vmatpush.msrb.mxu2 %v601_v0  ;;  %v787_v0 = vld [vmem:[%s1834_s4 + $0x108] sm:$0xff] }
  0xe6   : > { %719 = vmatpush.msrb.mxu2 %v598_v2  ;;  %v779_v2 = vld [vmem:[%s1834_s4 + $0xc8] sm:$0xff] }
  0xe8   : > { %720 = vmatpush.msrb.mxu2 %v595_v4  ;;  %v775_v4 = vld [vmem:[%s1834_s4 + $0xa8] sm:$0xff] }
  0xea   : > { %721 = vmatpush.msrb.mxu2 %v592_v5  ;;  %v549_v8 = vpop.f32.mrf.mxu0  ;;  %v770_v5 = vld [vmem:[%s1834_s4 + $0x80] sm:$0xff] }
  0xeb   : > { %v550_v47 = vadd.f32 %v1512_v35, %v549_v8  ;;  %v766_v8 = vld [vmem:[%s1834_s4 + $0x60] sm:$0xff]  ;;  %839 = vmatpush.msrb.mxu3 %v770_v5 }
  0xec   : > { %722 = vmatpush.msrb.mxu2 %v589_v6  ;;  %v771_v6 = vld [vmem:[%s1834_s4 + $0x88] sm:$0xff] }
  0xed   : > { %840 = vmatpush.msrb.mxu3 %v766_v8 }
  0xee   : > { %723 = vmatpush.msrb.mxu2 %v586_v7  ;;  %v816_v7 = vld [vmem:[%s1834_s4 + $0x1f0] sm:$0xff] }
  0xef   : > { %841 = vmatpush.msrb.mxu3 %v762_v12 }
  0xf0   : > { %724 = vmatpush.msrb.mxu2 %v583_v9  ;;  %v767_v9 = vld [vmem:[%s1834_s4 + $0x68] sm:$0xff] }
  0xf1   : > { %842 = vmatpush.msrb.mxu3 %v758_v15  ;;  %v818_v15 = vld [vmem:[%s1835_s5] sm:$0xf] }
  0xf2   : > { %725 = vmatpush.msrb.mxu2 %v580_v11  ;;  %v552_v18 = vpop.f32.mrf.mxu0  ;;  %v808_v11 = vld [vmem:[%s1834_s4 + $0x1b0] sm:$0xff] }
  0xf3   : > { %v553_v45 = vadd.f32 %v1512_v35, %v552_v18  ;;  %v754_v18 = vld [vmem:[%s1834_s4] sm:$0xff] }
  0xf4   : > { %726 = vmatpush.msrb.mxu2 %v577_v13  ;;  %v763_v13 = vld [vmem:[%s1834_s4 + $0x48] sm:$0xff]  ;;  %843 = vmatpush.msrb.mxu3 %v754_v18  ;;  %v820_v18 = vperm.slane %v818_v15, 0 }
  0xf6   : > { %727 = vmatpush.msrb.mxu2 %v574_v21  ;;  %v976_v21 = vld [vmem:[#allocation3 + $0x78] sm:$0xff]  ;;  %888 = vmatpush.msra.mxu3 %v817_v20  ;;  %v822_v20 = vperm.slane %v818_v15, 2 }
  0xf8   : > { %728 = vmatpush.msrb.mxu2 %v571_v26  ;;  %v809_v26 = vld [vmem:[%s1834_s4 + $0x1b8] sm:$0xff]  ;;  %889 = vmatpush.msra.mxu3 %v813_v23 }
  0xfa   : > { %729 = vmatpush.msrb.mxu2 %v568_v27  ;;  %v555_v28 = vpop.f32.mrf.mxu0  ;;  %v974_v27 = vld [vmem:[#allocation3 + $0x68] sm:$0xff]  ;;  %890 = vmatpush.msra.mxu3 %v809_v26 }
  0xfb   : > { %1146 = vmatmul.msk.f32.vlgmr.msrb.gmra.mxu2 %vm1556_vm3, %v1321_v30  ;;  %v556_v42 = vadd.f32 %v1512_v35, %v555_v28  ;;  %v788_v28 = vld [vmem:[%s1834_s4 + $0x110] sm:$0xff] }
  0xfc   : > { %868 = vmatpush.msra.mxu2 %v816_v7 }
  0xfe   : > { %869 = vmatpush.msra.mxu2 %v812_v10 }
 0x100   : > { %870 = vmatpush.msra.mxu2 %v808_v11 }
 0x102   : > { %v558_v29 = vpop.f32.mrf.mxu0  ;;  %871 = vmatpush.msra.mxu2 %v804_v14 }
 0x103   : > { %v559_v39 = vadd.f32 %v1512_v35, %v558_v29  ;;  %v805_v29 = vld [vmem:[%s1834_s4 + $0x198] sm:$0xff] }
 0x104   : > { %872 = vmatpush.msra.mxu2 %v800_v17  ;;  %891 = vmatpush.msra.mxu3 %v805_v29 }
 0x106   : > { %873 = vmatpush.msra.mxu2 %v796_v22  ;;  %892 = vmatpush.msra.mxu3 %v801_v32 }
 0x108   : > { %874 = vmatpush.msra.mxu2 %v792_v25  ;;  %893 = vmatpush.msra.mxu3 %v797_v38 }
 0x10a   : > { %v561_v31 = vpop.f32.mrf.mxu0  ;;  %875 = vmatpush.msra.mxu2 %v788_v28 }
 0x10b   : > { %v562_v37 = vadd.f32 %v1512_v35, %v561_v31  ;;  %v799_v35 = vld [vmem:[%s1834_s4 + $0x168] sm:$0xff]  ;;  %v784_v31 = vld [vmem:[%s1834_s4 + $0xf0] sm:$0xff] }
 0x10c   : > { %876 = vmatpush.msra.mxu2 %v784_v31  ;;  %v823_v31 = vperm.slane %v818_v15, 3 }
 0x10d   : > { %695 = vmatpush.msra.mxu1 %v562_v37  ;;  %v780_v37 = vld [vmem:[%s1834_s4 + $0xd0] sm:$0xff] }
 0x10e   : > { %877 = vmatpush.msra.mxu2 %v780_v37 }
 0x10f   : > { %696 = vmatpush.msra.mxu1 %v559_v39  ;;  %v971_v39 = vld [vmem:[#allocation3 + $0x50] sm:$0xff] }
 0x110   : > { %878 = vmatpush.msra.mxu2 %v776_v41 }
 0x111   : > { %697 = vmatpush.msra.mxu1 %v556_v42  ;;  %v793_v42 = vld [vmem:[%s1834_s4 + $0x138] sm:$0xff] }
 0x112   : > { %894 = vmatpush.msra.mxu3 %v793_v42 }
 0x113   : > { %698 = vmatpush.msra.mxu1 %v553_v45  ;;  %v772_v45 = vld [vmem:[%s1834_s4 + $0x90] sm:$0xff] }
 0x114   : > { %879 = vmatpush.msra.mxu2 %v772_v45 }
 0x115   : > { %699 = vmatpush.msra.mxu1 %v550_v47  ;;  %v789_v47 = vld [vmem:[%s1834_s4 + $0x118] sm:$0xff] }
 0x116   : > { %895 = vmatpush.msra.mxu3 %v789_v47 }
 0x117   : > { %700 = vmatpush.msra.mxu1 %v547_v50  ;;  %v768_v50 = vld [vmem:[%s1834_s4 + $0x70] sm:$0xff] }
 0x118   : > { %880 = vmatpush.msra.mxu2 %v768_v50  ;;  %896 = vmatpush.msra.mxu3 %v785_v51 }
 0x119   : > { %701 = vmatpush.msra.mxu1 %v544_v53  ;;  %v968_v53 = vld [vmem:[#allocation3 + $0x38] sm:$0xff] }
 0x11a   : > { %897 = vmatpush.msra.mxu3 %v781_v57 }
 0x11b   : > { %702 = vmatpush.msra.mxu1 %v541_v56  ;;  %v764_v56 = vld [vmem:[%s1834_s4 + $0x50] sm:$0xff] }
 0x11c   : > { %881 = vmatpush.msra.mxu2 %v764_v56 }
 0x11d   : > { %703 = vmatpush.msra.mxu1 %v538_v58  ;;  %v967_v58 = vld [vmem:[#allocation3 + $0x30] sm:$0xff] }
 0x11e   : > { %882 = vmatpush.msra.mxu2 %v760_v59 }
 0x11f   : > { %704 = vmatpush.msra.mxu1 %v535_v60  ;;  %v777_v60 = vld [vmem:[%s1834_s4 + $0xb8] sm:$0xff] }
 0x120   : > { %898 = vmatpush.msra.mxu3 %v777_v60 }
 0x121   : > { %705 = vmatpush.msra.mxu1 %v532_v55  ;;  %v966_v55 = vld [vmem:[#allocation3 + $0x28] sm:$0xff] }
 0x123   : > { %706 = vmatpush.msra.mxu1 %v529_v61  ;;  %v735_v61 = vmax.f32 %v661_v54, 1.0 }
 0x125   : > { %707 = vmatpush.msra.mxu1 %v526_v52  ;;  %v756_v52 = vld [vmem:[%s1834_s4 + $0x10] sm:$0xff]  ;;  %1213 = vrcp.f32 %v735_v61  ;;  %vm741_vm4 = vweird.f32 %v735_v61  ;;  %v747_v5 = vand.u32 2147483648, %v735_v61  ;;  %v745_v7 = vand.u32 2147483647, %v735_v61 }
 0x126   : > { %883 = vmatpush.msra.mxu2 %v756_v52 }
 0x127   : > { %708 = vmatpush.msra.mxu1 %v523_v62  ;;  %v773_v62 = vld [vmem:[%s1834_s4 + $0x98] sm:$0xff]  ;;  %vm746_vm7 = vcmp.eq.f32.partialorder %v745_v7, 8.507059e+37 }
 0x128   : > { %899 = vmatpush.msra.mxu3 %v773_v62 }
 0x129   : > { %709 = vmatpush.msra.mxu1 %v520_v49  ;;  %v965_v49 = vld [vmem:[#allocation3 + $0x20] sm:$0xff] }
 0x12a   : > { %1145 = vmatmul.msk.f32.vlgmr.msra.gmra.mxu1 %vm1552_vm2, %v1321_v30  ;;  %v973_v30 = vld [vmem:[#allocation3 + $0x60] sm:$0xff] }
 0x12b   : > { %848 = vmatpush.msrb.mxu1 %v815_v46  ;;  %v769_v46 = vld [vmem:[%s1834_s4 + $0x78] sm:$0xff] }
 0x12c   : > { %900 = vmatpush.msra.mxu3 %v769_v46 }
 0x12d   : > { %849 = vmatpush.msrb.mxu1 %v811_v40  ;;  %v964_v40 = vld [vmem:[#allocation3 + $0x18] sm:$0xff] }
 0x12f   : > { %850 = vmatpush.msrb.mxu1 %v807_v36  ;;  %v765_v36 = vld [vmem:[%s1834_s4 + $0x58] sm:$0xff] }
 0x130   : > { %901 = vmatpush.msra.mxu3 %v765_v36 }
 0x131   : > { %851 = vmatpush.msrb.mxu1 %v803_v33  ;;  %v963_v33 = vld [vmem:[#allocation3 + $0x10] sm:$0xff] }
 0x133   : > { %852 = vmatpush.msrb.mxu1 %v799_v35  ;;  %v761_v35 = vld [vmem:[%s1834_s4 + $0x38] sm:$0xff] }
 0x134   : > { %902 = vmatpush.msra.mxu3 %v761_v35 }
 0x135   : > { %853 = vmatpush.msrb.mxu1 %v795_v43  ;;  %v962_v43 = vld [vmem:[#allocation3 + $0x8] sm:$0xff] }
 0x137   : > { %854 = vmatpush.msrb.mxu1 %v791_v63  ;;  %v757_v63 = vld [vmem:[%s1834_s4 + $0x18] sm:$0xff] }
 0x138   : > { %903 = vmatpush.msra.mxu3 %v757_v63 }
 0x139   : > { %855 = vmatpush.msrb.mxu1 %v787_v0  ;;  %v961_v0 = vld [vmem:[#allocation3] sm:$0xff] }
 0x13b   : > { %856 = vmatpush.msrb.mxu1 %v783_v1  ;;  %v1214_v1 = vpop.eup %1213 }
 0x13c   : > { %vm742_vm5 = vweird.f32 %v1214_v1 }
 0x13d   : > { %857 = vmatpush.msrb.mxu1 %v779_v2  ;;  %v737_v2 = vmul.f32 %v1214_v1, %v735_v61  ;;  %vm743_vm6 = vmor %vm741_vm4, %vm742_vm5 }
 0x13f   : > { %858 = vmatpush.msrb.mxu1 %v775_v4  ;;  %v738_v3 = vsub.f32 1.0, %v737_v2  ;;  %v1212_v2 = vld [vmem:[%s1838_s8] ss:$0 sm:$0xff] }
 0x141   : > { %859 = vmatpush.msrb.mxu1 %v771_v6  ;;  %v739_v4 = vmul.f32 %v1214_v1, %v738_v3 }
 0x143   : > { %860 = vmatpush.msrb.mxu1 %v767_v9  ;;  %v740_v6 = vadd.f32 %v1214_v1, %v739_v4  ;;  %v748_v9 = vor.u32 1.1754944e-38, %v747_v5 }
 0x145   : > { %861 = vmatpush.msrb.mxu1 %v763_v13  ;;  %v744_v10 = vsel %vm743_vm6, %v1214_v1, %v740_v6 }
 0x146   : > { %v749_v13 = vsel %vm746_vm7, %v748_v9, %v744_v10 }
 0x147   : > { %862 = vmatpush.msrb.mxu1 %v759_v16  ;;  %v821_v16 = vperm.slane %v818_v15, 1 }
 0x149   : > { %863 = vmatpush.msrb.mxu1 %v755_v19 }
 0x14b   : > { %981 = vmatpush.msra.mxu1 %v976_v21  ;;  %v912_v21 = vld [vmem:[%s1836_s6] sm:$0xf] }
 0x14c   : > { %v916_v37 = vperm.slane %v912_v21, 2  ;;  %v917_v42 = vperm.slane %v912_v21, 3 }
 0x14d   : > { %982 = vmatpush.msra.mxu1 %v975_v24  ;;  %v914_v24 = vperm.slane %v912_v21, 0 }
 0x14f   : > { %983 = vmatpush.msra.mxu1 %v974_v27  ;;  %v915_v27 = vperm.slane %v912_v21, 1 }
 0x151   : > { %984 = vmatpush.msra.mxu1 %v973_v30 }
 0x153   : > { %985 = vmatpush.msra.mxu1 %v972_v34 }
 0x155   : > { %986 = vmatpush.msra.mxu1 %v971_v39 }
 0x157   : > { %987 = vmatpush.msra.mxu1 %v970_v44 }
 0x159   : > { %988 = vmatpush.msra.mxu1 %v969_v48 }
 0x15b   : > { %989 = vmatpush.msra.mxu1 %v968_v53 }
 0x15d   : > { %990 = vmatpush.msra.mxu1 %v967_v58 }
 0x15f   : > { %991 = vmatpush.msra.mxu1 %v966_v55 }
 0x161   : > { %992 = vmatpush.msra.mxu1 %v965_v49 }
 0x163   : > { %993 = vmatpush.msra.mxu1 %v964_v40 }
 0x165   : > { %994 = vmatpush.msra.mxu1 %v963_v33 }
 0x167   : > { %995 = vmatpush.msra.mxu1 %v962_v43 }
 0x169   : > { %996 = vmatpush.msra.mxu1 %v961_v0 }
 0x17e   : > { %v731_v8 = vpop.f32.mrf.mxu2 }
 0x1a7   : > { %v711_v11 = vpop.f32.mrf.mxu1 }
 0x1a8   : > { %v732_v12 = vadd.f32 %v731_v8, %v711_v11 }
 0x1aa   : > { %v750_v14 = vmul.f32 %v749_v13, %v732_v12 }
 0x1ac   : > { %1147 = vmatmul.msk.f32.vlgmr.msrb.gmra.mxu3 %vm734_vm8, %v750_v14  ;;  %1148 = vmatmul.msk.f32.vlgmr.msrb.gmra.mxu1 %vm734_vm8, %v750_v14 }
 0x1ad   : > { %1149 = vmatmul.msk.f32.vlgmr.msra.gmra.mxu2 %vm734_vm8, %v750_v14 }
 0x1b4   : > { %1150 = vmatmul.msk.f32.vlgmr.msra.gmra.mxu3 %vm734_vm8, %v750_v14  ;;  %1151 = vmatmul.msk.f32.vlgmr.msra.gmra.mxu1 %vm734_vm8, %v750_v14 }
 0x229   : > { %v865_v17 = vpop.f32.mrf.mxu1 }
 0x22a   : > { %v866_v19 = vadd.f32 %v865_v17, %v821_v16 }
 0x22c   : > { %v909_v26 = vmax.f32 %v866_v19, 0.0 }
 0x22e   : > { %v923_v32 = vmul.f32 %v915_v27, %v909_v26 }
 0x22f   : > { %v845_v22 = vpop.f32.mrf.mxu3 }
 0x230   : > { %v846_v23 = vadd.f32 %v845_v22, %v820_v18  ;;  %v885_v25 = vpop.f32.mrf.mxu2 }
 0x231   : > { %v886_v29 = vadd.f32 %v885_v25, %v822_v20  ;;  %v998_v4 = vpop.f32.mrf.mxu1 }
 0x232   : > { %v908_v28 = vmax.f32 %v846_v23, 0.0  ;;  %v999_v8 = vadd.f32 %v1212_v2, %v998_v4 }
 0x233   : > { %v910_v34 = vmax.f32 %v886_v29, 0.0 }
 0x234   : > { %v922_v30 = vmul.f32 %v914_v24, %v908_v28 }
 0x235   : > { %v924_v44 = vmul.f32 %v916_v37, %v910_v34 }
 0x236   : > { %v926_v39 = vadd.f32 %v923_v32, %v922_v30 }
 0x237   : > { %v905_v38 = vpop.f32.mrf.mxu3 }
 0x238   : > { %v906_v41 = vadd.f32 %v905_v38, %v823_v31  ;;  %v927_v48 = vadd.f32 %v926_v39, %v924_v44 }
 0x23a   : > { %v911_v45 = vmax.f32 %v906_v41, 0.0 }
 0x23c   : > { %v925_v47 = vmul.f32 %v917_v42, %v911_v45 }
 0x23e   : > { %v928_v50 = vadd.f32 %v927_v48, %v925_v47 }
 0x240   : > { %929 = vadd.xlane.f32.xlu0 %v928_v50 }
 0x2b3   : > { %v930_v51 = vpop.xlane.xlu0 %929 }
 0x2b4   : > { %v931_v53 = vrot.slane %v930_v51, 4 }
 0x2b6   : > { %v932_v54 = vmax.f32 %v930_v51, %v931_v53 }
 0x2b8   : > { %v933_v56 = vrot.slane %v932_v54, 2 }
 0x2ba   : > { %v934_v57 = vmax.f32 %v932_v54, %v933_v56 }
 0x2bc   : > { %v935_v58 = vrot.slane %v934_v57, 1 }
 0x2be   : > { %v936_v59 = vmax.f32 %v934_v57, %v935_v58 }
 0x2c0   : > { %v937_v60 = vsub.f32 %v930_v51, %v936_v59 }
 0x2c2   : > { %v938_v55 = vmul.f32 1.442695, %v937_v60 }
 0x2c4   : > { %1215 = vpow2.f32 %v938_v55 }
 0x2ca   : > { %v1216_v61 = vpop.eup %1215 }
 0x2cb   : > { %v940_v52 = vrot.slane %v1216_v61, 4 }
 0x2cd   : > { %v941_v62 = vadd.f32 %v1216_v61, %v940_v52 }
 0x2cf   : > { %v942_v49 = vrot.slane %v941_v62, 2 }
 0x2d1   : > { %v943_v46 = vadd.f32 %v942_v49, %v941_v62 }
 0x2d3   : > { %v944_v40 = vrot.slane %v943_v46, 1 }
 0x2d5   : > { %v945_v36 = vadd.f32 %v944_v40, %v943_v46 }
 0x2d7   : > { %1217 = vrcp.f32 %v945_v36  ;;  %v957_v63 = vand.u32 2147483648, %v945_v36  ;;  %v955_v1 = vand.u32 2147483647, %v945_v36  ;;  %vm951_vm10 = vweird.f32 %v945_v36 }
 0x2d9   : > { %v958_v5 = vor.u32 1.1754944e-38, %v957_v63  ;;  %vm956_vm12 = vcmp.eq.f32.partialorder %v955_v1, 8.507059e+37 }
 0x2dd   : > { %v1218_v33 = vpop.eup %1217 }
 0x2de   : > { %v947_v35 = vmul.f32 %v1218_v33, %v945_v36  ;;  %vm952_vm9 = vweird.f32 %v1218_v33 }
 0x2df   : > { %vm953_vm11 = vmor %vm951_vm10, %vm952_vm9 }
 0x2e0   : > { %v948_v43 = vsub.f32 1.0, %v947_v35 }
 0x2e2   : > { %v949_v0 = vmul.f32 %v1218_v33, %v948_v43 }
 0x2e4   : > { %v950_v3 = vadd.f32 %v1218_v33, %v949_v0 }
 0x2e6   : > { %v954_v6 = vsel %vm953_vm11, %v1218_v33, %v950_v3 }
 0x2e7   : > { %v959_v7 = vsel %vm956_vm12, %v958_v5, %v954_v6 }
 0x2e8   : > { %v960_v9 = vmul.f32 %v1216_v61, %v959_v7 }
 0x2ea   : > { %v1001_v10 = vmul.f32 %v999_v8, %v960_v9 }
 0x2ec   : > { %v1002_v11 = vrot.slane %v1001_v10, 4 }
 0x2ee   : > { %v1003_v12 = vadd.f32 %v1002_v11, %v1001_v10 }
 0x2f0   : > { %v1004_v13 = vrot.slane %v1003_v12, 2 }
 0x2f2   : > { %v1005_v14 = vadd.f32 %v1004_v13, %v1003_v12 }
 0x2f4   : > { %v1006_v15 = vrot.slane %v1005_v14, 1 }
 0x2f6   : > { %v1007_v16 = vadd.f32 %v1006_v15, %v1005_v14 }
 0x2f8   : > { %1008 = vst [vmem:[%s354_s23] sm:$0x1] %v1007_v16 }
 0x2f9   : > { %1276 = shalt.err (!%p1273_p8)
}
 0x2fa   : > { %1161 = dma.vmem_to_hbm [thread:$0]  (%p1410_p5), %s1021_s24, 16, %s1023_s25, %s1010_s26  }
 0x2fb PF: > { %p1173_p9 = scmp.ge.s32.totalorder %s1315_s12, 2  ;;  %s1034_s16 = sand.u32 1, %s1303_s30  }
 0x2fc   : > { %s1035_s22 = scalar_lea.sflag [#allocation5], %s1034_s16 }
 0x2fd   : > { %p1168_p10 = pnand %p1173_p9, %p1414_p6 }
 0x2ff   : > { %p1169_p11 = pneg %p1168_p10 }
 0x301   : > { %1298 = dma.done.wait (%p1169_p11), %s1035_s22, 16  }
 0x302   : > { %1300 = vsyncadd (%p1169_p11), %s1035_s22, 4294967280  ;;  %p20_p12 = scmp.ge.s32.totalorder %s1397_s15, 4   ;;  %s1846_s30 = smov %s1307_s10 }
 0x303   : > { %s1847_s10 = smov %s1311_s11  ;;  %s1848_s11 = smov %s1408_s18 }
 0x304   : > { %s1849_s12 = smov %s1397_s15  ;;  %22 = sbr.rel (!%p20_p12) target bundleno = 4 (0x4), region = 99 }
 0x309   :  { %1040 = vsyncpa [#allocation4], 1 }
 0x30a   :  { %1042 = vsyncpa [#allocation4 + $0x1], 1 }
 0x30b   :  { %1043 = vsyncpa [#allocation5], 1 }
 0x30c   :  { %1045 = vsyncpa [#allocation5 + $0x1], 1 }

</bundles_post_ra>
